<compile_context>
chip_gen: v5e
topology: v5e:2x2
jax: 0.10.0
libtpu: 0.0.40
codegen_flags: <defaults>
</compile_context>

<pallas_src>
import functools

import jax
import jax.numpy as jnp
from jax.experimental import pallas as pl
from jax.experimental.pallas import tpu as pltpu


def _gam_channel_kernel(x_ref, w1_ref, b1_ref, w2_ref, b2_ref, o_ref):
    # x_ref: (1, C, THW) tile -- channels on sublanes, spatial on lanes.
    x = x_ref[0]                                            # (C, THW), native dtype

    # Linear 1 (contraction over C) on the MXU: (R, C) @ (C, THW) -> (R, THW).
    w1 = w1_ref[...]
    if w1.dtype != x.dtype:
        w1 = w1.astype(x.dtype)      # tiny weight cast; big x tile stays native
    h = jnp.dot(w1, x, preferred_element_type=jnp.float32)
    h = jnp.maximum(h + b1_ref[...].astype(jnp.float32), 0.0)   # (R, THW), ReLU

    # Linear 2: y[c, s] = sum_r w2[c, r] * h[r, s] + b2[c]
    w2 = w2_ref[...].astype(jnp.float32)                    # (C, R), tiny
    r_dim = w2.shape[1]
    if r_dim >= 8:
        # Realistic R: use the (otherwise idle) MXU.
        y = jnp.dot(w2, h, preferred_element_type=jnp.float32)
    else:
        # Tiny R: R rank-1 VPU broadcast-FMAs in full f32 (static unroll).
        y = w2[:, 0:1] * h[0:1, :]
        for r in range(1, r_dim):
            y = y + w2[:, r:r + 1] * h[r:r + 1, :]
    y = y + b2_ref[...].astype(jnp.float32)                 # + (C, 1) bias

    o_ref[0] = jax.nn.sigmoid(y).astype(o_ref.dtype)        # lane-dense store


_TARGET_BLOCK_BYTES = 2 << 20    # ~2 MiB per x / out block (amortizes step overhead)
_PIPE_BYTES_CAP = 16 << 20       # 2x double-buffered (input + output) blocks
_VMEM_LIMIT_BYTES = 32 << 20     # < 64 MiB physical on v7x, < 128 MiB on v5e/v6e


def _pick_spatial_tile(hw, c, elem_bytes, batch, spatial_tile):
    """Lane-tile (multiple of 128, or full hw when hw <= 128), VMEM-budgeted."""
    if hw <= 128:
        # Full dim is a legal block shape; tensor is tiny, overhead-dominated
        # anyway.  (Folding B*HW onto lanes would need a physical transpose.)
        return hw
    if spatial_tile is not None:
        thw = spatial_tile
    else:
        thw = _TARGET_BLOCK_BYTES // (c * elem_bytes)
    thw = min(thw, _PIPE_BYTES_CAP // (4 * c * elem_bytes), hw)
    thw = max(128, (thw // 128) * 128)
    # v7x has 2 TensorCores: make sure a fully "parallel" grid has >= 2 steps.
    if batch * (-(-hw // thw)) < 2 and thw > 128:
        thw = max(128, ((thw // 2) // 128) * 128)
    return thw


@functools.partial(jax.jit, static_argnames=("spatial_tile",))
def gam_channel_forward(x, w1, b1, w2, b2, *, spatial_tile=None):
    """GAM channel attention.

    Args:
      x:  (B, C, H, W) activations.
      w1: (R, C)  first Linear weight (PyTorch layout), R = C // ratio.
      b1: (R, 1)  first Linear bias.
      w2: (C, R)  second Linear weight (PyTorch layout).
      b2: (C, 1)  second Linear bias.
    Returns sigmoid(MLP_channel(x)) with shape (B, C, H, W).
    """
    b, c, h, w = x.shape
    r = w1.shape[0]
    hw = h * w

    elem_bytes = jnp.dtype(x.dtype).itemsize
    thw = _pick_spatial_tile(hw, c, elem_bytes, b, spatial_tile)
    num_tiles = -(-hw // thw)

    # Free view; NO pad and NO output slice -- ragged tail is a partial block.
    x3 = x.reshape(b, c, hw)

    out3 = pl.pallas_call(
        _gam_channel_kernel,
        out_shape=jax.ShapeDtypeStruct((b, c, hw), x.dtype),
        grid_spec=pltpu.PrefetchScalarGridSpec(
            num_scalar_prefetch=0,
            grid=(b, num_tiles),
            in_specs=[
                pl.BlockSpec((1, c, thw), lambda bi, ti: (bi, 0, ti)),  # x tile
                pl.BlockSpec((r, c), lambda bi, ti: (0, 0)),            # W1
                pl.BlockSpec((r, 1), lambda bi, ti: (0, 0)),            # b1
                pl.BlockSpec((c, r), lambda bi, ti: (0, 0)),            # W2
                pl.BlockSpec((c, 1), lambda bi, ti: (0, 0)),            # b2
            ],
            out_specs=pl.BlockSpec((1, c, thw), lambda bi, ti: (bi, 0, ti)),
        ),
        compiler_params=pltpu.CompilerParams(
            dimension_semantics=("parallel", "parallel"),
            vmem_limit_bytes=_VMEM_LIMIT_BYTES,
        ),
    )(x3, w1, b1, w2, b2)

    return out3.reshape(b, c, h, w)


def _reference(x, w1, b1, w2, b2):
    b_, c_, h_, w_ = x.shape
    xp = jnp.transpose(x, (0, 2, 3, 1)).reshape(b_, -1, c_)     # (B, HW, C)
    hid = jnp.maximum(xp @ w1.T + b1[:, 0], 0.0)                # (B, HW, R)
    y = hid @ w2.T + b2[:, 0]                                   # (B, HW, C)
    y = jnp.transpose(y.reshape(b_, h_, w_, c_), (0, 3, 1, 2))
    return jax.nn.sigmoid(y)


def _make_params(c, ratio, key):
    r = max(c // ratio, 1)
    kw1, kb1, kw2, kb2 = jax.random.split(key, 4)
    bound1 = 1.0 / (c ** 0.5)
    bound2 = 1.0 / (r ** 0.5)
    w1 = jax.random.uniform(kw1, (r, c), jnp.float32, -bound1, bound1)
    b1 = jax.random.uniform(kb1, (r, 1), jnp.float32, -bound1, bound1)
    w2 = jax.random.uniform(kw2, (c, r), jnp.float32, -bound2, bound2)
    b2 = jax.random.uniform(kb2, (c, 1), jnp.float32, -bound2, bound2)
    return w1, b1, w2, b2


if __name__ == "__main__":
    key = jax.random.PRNGKey(0)
    k1, k2, kx1, kx2 = jax.random.split(key, 4)

    # Case 1: GAM_Channel(in_channels=32, ratio=16) on (2, 32, 8, 8); R = 2
    # exercises the VPU rank-1 path and the full-dim (<128) lane tile.
    B, C, H, W = 2, 32, 8, 8
    x = jax.random.normal(kx1, (B, C, H, W), dtype=jnp.float32)
    params = _make_params(C, 16, k1)
    out = jax.block_until_ready(gam_channel_forward(x, *params))
    ref = _reference(x, *params)
    assert out.shape == (B, C, H, W)
    assert jnp.allclose(out, ref, atol=5e-5, rtol=5e-5), float(
        jnp.max(jnp.abs(out - ref)))

    # Case 2: ragged H*W (260, not a multiple of 128) exercises the partial
    # boundary block (no wrapper pad/slice), plus R = 8 -> MXU second linear.
    B2, C2, H2, W2 = 1, 64, 20, 13
    x2 = jax.random.normal(kx2, (B2, C2, H2, W2), dtype=jnp.float32)
    params2 = _make_params(C2, 8, k2)
    out2 = jax.block_until_ready(gam_channel_forward(x2, *params2))
    ref2 = _reference(x2, *params2)
    assert out2.shape == (B2, C2, H2, W2)
    assert jnp.allclose(out2, ref2, atol=5e-5, rtol=5e-5), float(
        jnp.max(jnp.abs(out2 - ref2)))

    print("KERNEL_OK")
</pallas_src>

<mosaic_0001>
module attributes {stable_mosaic.version = 11 : i64} {
  func.func @_gam_channel_kernel(%arg0: i32, %arg1: i32, %arg2: memref<1x32x64xf32, #tpu.memory_space<vmem>>, %arg3: memref<2x32xf32, #tpu.memory_space<vmem>>, %arg4: memref<2x1xf32, #tpu.memory_space<vmem>>, %arg5: memref<32x2xf32, #tpu.memory_space<vmem>>, %arg6: memref<32x1xf32, #tpu.memory_space<vmem>>, %arg7: memref<1x32x64xf32, #tpu.memory_space<vmem>>) attributes {dimension_semantics = [#tpu.dimension_semantics<parallel>, #tpu.dimension_semantics<parallel>], iteration_bounds = array<i64: 2, 1>, scalar_prefetch = 0 : i64, scratch_operands = 0 : i64, tpu.core_type = #tpu.core_type<tc>, window_params = [{transform_indices = @transform_0, window_bounds = array<i64: 1, 32, 64>}, {pipeline_mode = #tpu.pipeline_mode<synchronous>, transform_indices = @transform_1, window_bounds = array<i64: 2, 32>}, {pipeline_mode = #tpu.pipeline_mode<synchronous>, transform_indices = @transform_2, window_bounds = array<i64: 2, 1>}, {pipeline_mode = #tpu.pipeline_mode<synchronous>, transform_indices = @transform_3, window_bounds = array<i64: 32, 2>}, {pipeline_mode = #tpu.pipeline_mode<synchronous>, transform_indices = @transform_4, window_bounds = array<i64: 32, 1>}, {transform_indices = @transform_5, window_bounds = array<i64: 1, 32, 64>}]} {
    %c0 = arith.constant 0 : index
    %c0_0 = arith.constant 0 : index
    %c0_1 = arith.constant 0 : index
    %0 = vector.load %arg2[%c0, %c0_0, %c0_1] : memref<1x32x64xf32, #tpu.memory_space<vmem>>, vector<1x32x64xf32>
    %1 = vector.shape_cast %0 : vector<1x32x64xf32> to vector<32x64xf32>
    %c0_2 = arith.constant 0 : index
    %c0_3 = arith.constant 0 : index
    %2 = vector.load %arg3[%c0_2, %c0_3] : memref<2x32xf32, #tpu.memory_space<vmem>>, vector<2x32xf32>
    %cst = arith.constant dense<0.000000e+00> : vector<2x64xf32>
    %3 = tpu.matmul %2, %1, %cst {dimension_numbers = #tpu.dot_dimension_numbers<[1], [0], [0], [1], [0, 0, 1, 1], [], []>} : vector<2x32xf32>, vector<32x64xf32>, vector<2x64xf32> -> vector<2x64xf32>
    %c0_4 = arith.constant 0 : index
    %c0_5 = arith.constant 0 : index
    %4 = vector.load %arg4[%c0_4, %c0_5] : memref<2x1xf32, #tpu.memory_space<vmem>>, vector<2x1xf32>
    %5 = vector.broadcast %4 : vector<2x1xf32> to vector<2x64xf32>
    %6 = arith.addf %3, %5 : vector<2x64xf32>
    %cst_6 = arith.constant 0.000000e+00 : f32
    %7 = vector.broadcast %cst_6 : f32 to vector<2x64xf32>
    %8 = arith.maximumf %6, %7 : vector<2x64xf32>
    %c0_7 = arith.constant 0 : index
    %c0_8 = arith.constant 0 : index
    %9 = vector.load %arg5[%c0_7, %c0_8] : memref<32x2xf32, #tpu.memory_space<vmem>>, vector<32x2xf32>
    %10 = vector.extract_strided_slice %9 {offsets = [0, 0], sizes = [32, 1], strides = [1, 1]} : vector<32x2xf32> to vector<32x1xf32>
    %11 = vector.extract_strided_slice %8 {offsets = [0, 0], sizes = [1, 64], strides = [1, 1]} : vector<2x64xf32> to vector<1x64xf32>
    %12 = vector.broadcast %10 : vector<32x1xf32> to vector<32x64xf32>
    %13 = vector.broadcast %11 : vector<1x64xf32> to vector<32x64xf32>
    %14 = arith.mulf %12, %13 : vector<32x64xf32>
    %15 = vector.extract_strided_slice %9 {offsets = [0, 1], sizes = [32, 1], strides = [1, 1]} : vector<32x2xf32> to vector<32x1xf32>
    %16 = vector.extract_strided_slice %8 {offsets = [1, 0], sizes = [1, 64], strides = [1, 1]} : vector<2x64xf32> to vector<1x64xf32>
    %17 = vector.broadcast %15 : vector<32x1xf32> to vector<32x64xf32>
    %18 = vector.broadcast %16 : vector<1x64xf32> to vector<32x64xf32>
    %19 = arith.mulf %17, %18 : vector<32x64xf32>
    %20 = arith.addf %14, %19 : vector<32x64xf32>
    %c0_9 = arith.constant 0 : index
    %c0_10 = arith.constant 0 : index
    %21 = vector.load %arg6[%c0_9, %c0_10] : memref<32x1xf32, #tpu.memory_space<vmem>>, vector<32x1xf32>
    %22 = vector.broadcast %21 : vector<32x1xf32> to vector<32x64xf32>
    %23 = arith.addf %20, %22 : vector<32x64xf32>
    %24 = arith.negf %23 : vector<32x64xf32>
    %25 = math.exp %24 : vector<32x64xf32>
    %cst_11 = arith.constant 1.000000e+00 : f32
    %26 = vector.broadcast %cst_11 : f32 to vector<32x64xf32>
    %27 = arith.addf %26, %25 : vector<32x64xf32>
    %28 = arith.divf %26, %27 : vector<32x64xf32>
    %c0_12 = arith.constant 0 : index
    %c0_13 = arith.constant 0 : index
    %c0_14 = arith.constant 0 : index
    %29 = vector.load %arg7[%c0_12, %c0_13, %c0_14] : memref<1x32x64xf32, #tpu.memory_space<vmem>>, vector<1x32x64xf32>
    %30 = vector.shape_cast %29 : vector<1x32x64xf32> to vector<32x64xf32>
    %31 = vector.shape_cast %28 : vector<32x64xf32> to vector<1x32x64xf32>
    tpu.vector_store %arg7[%c0_12, %c0_13, %c0_14], %31 {strides = array<i32>} : memref<1x32x64xf32, #tpu.memory_space<vmem>>, vector<1x32x64xf32>,
    return
  }
  func.func @transform_0(%arg0: i32, %arg1: i32) -> (i32, i32, i32) {
    %c0_i32 = arith.constant 0 : i32
    %c0_i32_0 = arith.constant 0 : i32
    return %arg0, %c0_i32, %arg1 : i32, i32, i32
  }
  func.func @transform_1(%arg0: i32, %arg1: i32) -> (i32, i32) {
    %c0_i32 = arith.constant 0 : i32
    %c0_i32_0 = arith.constant 0 : i32
    %c0_i32_1 = arith.constant 0 : i32
    return %c0_i32, %c0_i32_0 : i32, i32
  }
  func.func @transform_2(%arg0: i32, %arg1: i32) -> (i32, i32) {
    %c0_i32 = arith.constant 0 : i32
    %c0_i32_0 = arith.constant 0 : i32
    %c0_i32_1 = arith.constant 0 : i32
    return %c0_i32, %c0_i32_0 : i32, i32
  }
  func.func @transform_3(%arg0: i32, %arg1: i32) -> (i32, i32) {
    %c0_i32 = arith.constant 0 : i32
    %c0_i32_0 = arith.constant 0 : i32
    %c0_i32_1 = arith.constant 0 : i32
    return %c0_i32, %c0_i32_0 : i32, i32
  }
  func.func @transform_4(%arg0: i32, %arg1: i32) -> (i32, i32) {
    %c0_i32 = arith.constant 0 : i32
    %c0_i32_0 = arith.constant 0 : i32
    %c0_i32_1 = arith.constant 0 : i32
    return %c0_i32, %c0_i32_0 : i32, i32
  }
  func.func @transform_5(%arg0: i32, %arg1: i32) -> (i32, i32, i32) {
    %c0_i32 = arith.constant 0 : i32
    %c0_i32_0 = arith.constant 0 : i32
    return %arg0, %c0_i32, %arg1 : i32, i32, i32
  }
}

</mosaic_0001>

<bundles_post_ra>
// kernel: gam_channel_forward.1
= control target key start
LH: loop header
LB: loop body
LE: loop exit
PB: predicated region body
PF: predicated region fallthrough
CT: control target
= control target key end

     0   :  { %s662_s18 = smov 0   ;;  %s664_s19 = smov 0   ;;  %s756_s0 = inlined_call_operand.vmem [shape: f32[2,32,64], index: 0, kind: input, shape index: {}]   ;;  %s757_s1 = inlined_call_operand.vmem [shape: f32[2,32], index: 1, kind: input, shape index: {}]   ;;  %s758_s2 = inlined_call_operand.vmem [shape: f32[2,1], index: 2, kind: input, shape index: {}]   ;;  %s759_s3 = inlined_call_operand.vmem [shape: f32[32,2], index: 3, kind: input, shape index: {}]   ;;  %s760_s4 = inlined_call_operand.vmem [shape: f32[32,1], index: 4, kind: input, shape index: {}]   ;;  %s761_s5 = inlined_call_operand.vmem [shape: f32[2,32,64], index: 5, kind: output, shape index: {}]  }
   0x1   :  { %s666_s20 = smov 0  }
   0x2 LB: > { %s27_s21 = sadd.s32 1, %s624_s19  ;;  %p542_p0 = scmp.ge.s32.totalorder %s628_s20, 1  ;;  %s628_s20 = sphi %s666_s20, %s15_s20   ;;  %s624_s19 = sphi %s664_s19, %s767_s19   ;;  %s620_s18 = sphi %s662_s18, %s766_s18  }
   0x3   : > { %p29_p1 = scmp.ge.s32.totalorder %s27_s21, 2  ;;  %p206_p2 = scmp.lt.s32.totalorder %s628_s20, 3 }
   0x5   : > { %s769_s21 = smov (%p29_p1, %s27_s21), 0  ;;  %p207_p3 = pnand %p542_p0, %p206_p2 }
   0x6   : > { %p240_p4 = scmp.lt.s32.totalorder (!%p207_p3), %s620_s18, 1 }
   0x7   : > { %210 = sbr.rel (%p207_p3) target bundleno = 194 (0xc2), region = 40 }
   0xc   : > { %v293_v0 = vld [vmem:[%s759_s3 + $0x8] sm:$0xff]  ;;  %v630_v1 = vmov 1   ;;  %v631_v2 = vmov 0   ;;  %s771_s18 = smov (!%p240_p4, %s620_s18), 1  ;;  %v295_v3 = vld [vmem:[%s759_s3 + $0x18] sm:$0xff]  ;;  %v294_v6 = vld [vmem:[%s759_s3 + $0x10] sm:$0xff] }
   0xd   : > { %585 = vset.pattern.permute.xlu0 %v630_v1  ;;  %582 = vset.pattern.permute.xlu1 %v631_v2  ;;  %s554_s26 = sshll.u32 %s771_s18, 5  ;;  %v261_v7 = vld [vmem:[%s758_s2] sm:$0x3]  ;;  %vm267_vm0 = vcmask 261120   ;;  %v348_v12 = vld [vmem:[%s760_s4 + $0x10] sm:$0xff]  ;;  %v347_v14 = vld [vmem:[%s760_s4 + $0x8] sm:$0xff] }
   0xe   : > { %326 = vperm.xlu0 %585, %v293_v0   ;;  %303 = vperm.xlu1 %582, %v293_v0   ;;  %s247_s29 = scalar_lea.vmem %s756_s0, %s554_s26  ;;  %v260_v10 = vld [vmem:[%s757_s1] sm:$0x3]  ;;  %v349_v15 = vld [vmem:[%s760_s4 + $0x18] sm:$0xff]  ;;  %vm450_vm1 = vcmask 523264   ;;  %s731_s28 = scalar_lea.vmem %s761_s5, %s554_s26 }
   0xf   : > { %583 = vset.pattern.permute.xlu2 %v631_v2  ;;  %v259_v4 = vld [vmem:[%s247_s29 + $0x18] sm:$0xff]  ;;  %v258_v5 = vld [vmem:[%s247_s29 + $0x10] sm:$0xff]  ;;  %v257_v8 = vld [vmem:[%s247_s29 + $0x8] sm:$0xff] }
  0x10   : > { %313 = vperm.xlu2 %583, %v295_v3   ;;  %283 = vmatpush.msra.mxu0 %v259_v4  ;;  %v256_v9 = vld [vmem:[%s247_s29] sm:$0xff] }
  0x11   : > { %v292_v11 = vld [vmem:[%s759_s3] sm:$0xff] }
  0x12   : > { %284 = vmatpush.msra.mxu0 %v258_v5  ;;  %v346_v13 = vld [vmem:[%s760_s4] sm:$0xff] }
  0x14   : > { %285 = vmatpush.msra.mxu0 %v257_v8 }
  0x16   : > { %586 = vset.pattern.permute.xlu0 %v631_v2  ;;  %308 = vperm.xlu1 %582, %v294_v6  }
  0x17   : > { %264 = vperm.xlu0 %586, %v261_v7   ;;  %286 = vmatpush.msra.mxu0 %v256_v9 }
  0x18   : > { %584 = vset.pattern.permute.xlu2 %v630_v1  ;;  %547 = vmatmul.msk.f32.vlgmr.msra.gmra.mxu0 %vm267_vm0, %v260_v10 }
  0x19   : > { %322 = vperm.xlu2 %584, %v292_v11  }
  0x1e   : > { %587 = vset.pattern.permute.xlu1 %v630_v1 }
  0x1f   : > { %330 = vperm.xlu1 %587, %v294_v6   ;;  %298 = vperm.xlu0 %586, %v292_v11  }
  0x21   : > { %334 = vperm.xlu2 %584, %v295_v3  }
  0x27   : > { %588 = vset.pattern.permute.xlu1 %v631_v2  ;;  %362 = vperm.xlu0 %586, %v348_v12  }
  0x28   : > { %352 = vperm.xlu1 %588, %v346_v13  }
  0x29   : > { %589 = vset.pattern.permute.xlu2 %v631_v2 }
  0x2a   : > { %357 = vperm.xlu2 %589, %v347_v14  }
  0x30   : > { %367 = vperm.xlu1 %588, %v349_v15  }
  0x6a   : > { %v314_v18 = vpop.permute.xlu2 %313 }
  0x73   : > { %v323_v21 = vpop.permute.xlu2 %322 }
  0x7b   : > { %v335_v25 = vpop.permute.xlu2 %334 }
  0x80   : > { %v304_v16 = vpop.permute.xlu1 %303  ;;  %v327_v17 = vpop.permute.xlu0 %326 }
  0x84   : > { %v358_v41 = vpop.permute.xlu2 %357 }
  0x88   : > { %v309_v19 = vpop.permute.xlu1 %308 }
  0x89   : > { %v265_v20 = vpop.permute.xlu0 %264 }
  0x91   : > { %v331_v22 = vpop.permute.xlu1 %330  ;;  %v299_v23 = vpop.permute.xlu0 %298 }
  0x95   : > { %v288_v24 = vpop.f32.mrf.mxu0 }
  0x96   : > { %v289_v26 = vadd.f32 %v288_v24, %v265_v20 }
  0x98   : > { %v291_v27 = vmax.f32 %v289_v26, 0.0 }
  0x99   : > { %v363_v42 = vpop.permute.xlu0 %362 }
  0x9a   : > { %v353_v28 = vpop.permute.xlu1 %352  ;;  %v316_v29 = vperm.slane %v291_v27, 0  ;;  %v337_v30 = vperm.slane %v291_v27, 1 }
  0x9c   : > { %v319_v31 = vmul.f32 %v316_v29, %v309_v19  ;;  %v340_v32 = vmul.f32 %v337_v30, %v331_v22  ;;  %v317_v33 = vmul.f32 %v316_v29, %v299_v23  ;;  %v338_v34 = vmul.f32 %v337_v30, %v323_v21 }
  0x9d   : > { %v318_v35 = vmul.f32 %v316_v29, %v304_v16  ;;  %v339_v36 = vmul.f32 %v337_v30, %v327_v17  ;;  %v320_v37 = vmul.f32 %v316_v29, %v314_v18  ;;  %v341_v38 = vmul.f32 %v337_v30, %v335_v25 }
  0x9e   : > { %v344_v39 = vadd.f32 %v340_v32, %v319_v31  ;;  %v342_v40 = vadd.f32 %v338_v34, %v317_v33 }
  0x9f   : > { %v343_v43 = vadd.f32 %v339_v36, %v318_v35  ;;  %v345_v44 = vadd.f32 %v341_v38, %v320_v37 }
  0xa0   : > { %v372_v45 = vadd.f32 %v363_v42, %v344_v39  ;;  %v370_v46 = vadd.f32 %v353_v28, %v342_v40 }
  0xa1   : > { %v371_v48 = vadd.f32 %v358_v41, %v343_v43 }
  0xa2   : > { %v368_v47 = vpop.permute.xlu1 %367  ;;  %v550_v50 = vmul.f32 -1.442695, %v372_v45  ;;  %v548_v51 = vmul.f32 -1.442695, %v370_v46 }
  0xa3   : > { %v373_v49 = vadd.f32 %v368_v47, %v345_v44  ;;  %v549_v52 = vmul.f32 -1.442695, %v371_v48 }
  0xa4   : > { %590 = vpow2.f32 %v550_v50 }
  0xa5   : > { %v551_v53 = vmul.f32 -1.442695, %v373_v49  ;;  %592 = vpow2.f32 %v548_v51 }
  0xa6   : > { %594 = vpow2.f32 %v549_v52 }
  0xa7   : > { %596 = vpow2.f32 %v551_v53 }
  0xaa   : > { %v591_v54 = vpop.eup %590 }
  0xab   : > { %v593_v55 = vpop.eup %592  ;;  %v388_v56 = vadd.f32 1.0, %v591_v54 }
  0xac   : > { %v595_v57 = vpop.eup %594  ;;  %v386_v58 = vadd.f32 1.0, %v593_v55 }
  0xad   : > { %v597_v59 = vpop.eup %596  ;;  %598 = vrcp.f32 %v388_v56  ;;  %v387_v60 = vadd.f32 1.0, %v595_v57  ;;  %v429_v63 = vand.u32 2147483647, %v388_v56  ;;  %v431_v2 = vand.u32 2147483648, %v388_v56 }
  0xae   : > { %600 = vrcp.f32 %v386_v58  ;;  %v389_v61 = vadd.f32 1.0, %v597_v59  ;;  %v399_v4 = vand.u32 2147483647, %v386_v58  ;;  %v401_v6 = vand.u32 2147483648, %v386_v58 }
  0xaf   : > { %602 = vrcp.f32 %v387_v60  ;;  %vm425_vm2 = vweird.f32 %v388_v56  ;;  %vm718_vm3 = vcmp.eq.f32.partialorder %v429_v63, 8.507059e+37  ;;  %vm395_vm4 = vweird.f32 %v386_v58 }
  0xb0   : > { %604 = vrcp.f32 %v389_v61  ;;  %v432_v12 = vor.u32 1.1754944e-38, %v431_v2  ;;  %vm722_vm7 = vcmp.eq.f32.partialorder %v399_v4, 8.507059e+37  ;;  %v402_v18 = vor.u32 1.1754944e-38, %v401_v6 }
  0xb1   : > { %v414_v20 = vand.u32 2147483647, %v387_v60  ;;  %v416_v22 = vand.u32 2147483648, %v387_v60  ;;  %v444_v24 = vand.u32 2147483647, %v389_v61  ;;  %v446_v27 = vand.u32 2147483648, %v389_v61 }
  0xb2   : > { %vm410_vm12 = vweird.f32 %v387_v60  ;;  %vm440_vm14 = vweird.f32 %v389_v61 }
  0xb3   : > { %v599_v62 = vpop.eup %598  ;;  %v417_v33 = vor.u32 1.1754944e-38, %v416_v22  ;;  %vm415_vm15 = vcmp.eq.f32.partialorder %v414_v20, 8.507059e+37  ;;  %v447_v36 = vor.u32 1.1754944e-38, %v446_v27 }
  0xb4   : > { %v601_v0 = vpop.eup %600  ;;  %v421_v1 = vmul.f32 %v599_v62, %v388_v56  ;;  %vm426_vm5 = vweird.f32 %v599_v62 }
  0xb5   : > { %v391_v3 = vmul.f32 %v601_v0, %v386_v58  ;;  %v603_v7 = vpop.eup %602  ;;  %vm396_vm6 = vweird.f32 %v601_v0  ;;  %vm427_vm8 = vmor %vm425_vm2, %vm426_vm5  ;;  %vm445_vm2 = vcmp.eq.f32.partialorder %v444_v24, 8.507059e+37 }
  0xb6   : > { %v422_v5 = vsub.f32 1.0, %v421_v1  ;;  %v605_v10 = vpop.eup %604  ;;  %v406_v13 = vmul.f32 %v603_v7, %v387_v60  ;;  %vm397_vm9 = vmor %vm395_vm4, %vm396_vm6  ;;  %vm411_vm10 = vweird.f32 %v603_v7 }
  0xb7   : > { %v392_v9 = vsub.f32 1.0, %v391_v3  ;;  %v436_v16 = vmul.f32 %v605_v10, %v389_v61  ;;  %vm441_vm11 = vweird.f32 %v605_v10  ;;  %vm412_vm13 = vmor %vm410_vm12, %vm411_vm10 }
  0xb8   : > { %v423_v11 = vmul.f32 %v599_v62, %v422_v5  ;;  %v407_v19 = vsub.f32 1.0, %v406_v13  ;;  %vm442_vm0 = vmor %vm440_vm14, %vm441_vm11 }
  0xb9   : > { %v393_v14 = vmul.f32 %v601_v0, %v392_v9  ;;  %v437_v23 = vsub.f32 1.0, %v436_v16 }
  0xba   : > { %v424_v17 = vadd.f32 %v599_v62, %v423_v11  ;;  %v408_v26 = vmul.f32 %v603_v7, %v407_v19 }
  0xbb   : > { %v394_v21 = vadd.f32 %v601_v0, %v393_v14  ;;  %v438_v30 = vmul.f32 %v605_v10, %v437_v23 }
  0xbc   : > { %v428_v25 = vsel %vm427_vm8, %v599_v62, %v424_v17  ;;  %v409_v32 = vadd.f32 %v603_v7, %v408_v26 }
  0xbd   : > { %v433_v28 = vsel %vm718_vm3, %v432_v12, %v428_v25  ;;  %v398_v29 = vsel %vm397_vm9, %v601_v0, %v394_v21  ;;  %v439_v34 = vadd.f32 %v605_v10, %v438_v30 }
  0xbe   : > { %453 = vst.msk [vmem:[%s731_s28 + $0x10] sm:$0xff] %vm450_vm1, %v433_v28  ;;  %v403_v31 = vsel %vm722_vm7, %v402_v18, %v398_v29  ;;  %v413_v35 = vsel %vm412_vm13, %v603_v7, %v409_v32 }
  0xbf   : > { %451 = vst.msk [vmem:[%s731_s28] sm:$0xff] %vm450_vm1, %v403_v31  ;;  %v418_v37 = vsel %vm415_vm15, %v417_v33, %v413_v35  ;;  %v443_v38 = vsel %vm442_vm0, %v605_v10, %v439_v34 }
  0xc0   : > { %452 = vst.msk [vmem:[%s731_s28 + $0x8] sm:$0xff] %vm450_vm1, %v418_v37  ;;  %v448_v39 = vsel %vm445_vm2, %v447_v36, %v443_v38 }
  0xc1   : > { %454 = vst.msk [vmem:[%s731_s28 + $0x18] sm:$0xff] %vm450_vm1, %v448_v39 }
  0xc2 PF: > { %s15_s20 = sadd.s32 1, %s628_s20   ;;  %s766_s18 = smov %s624_s19 }
  0xc3   : > { %p12_p5 = scmp.ge.s32.totalorder %s15_s20, 4   ;;  %s767_s19 = smov %s769_s21 }
  0xc5   :  { %14 = sbr.rel (!%p12_p5) target bundleno = 2 (0x2), region = 70 }

</bundles_post_ra>
